<compile_context>
chip_gen: v5e
topology: v5e:2x2
jax: 0.10.0
libtpu: 0.0.40
codegen_flags: <defaults>
</compile_context>

<pallas_src>
import functools

import jax
import jax.numpy as jnp
from jax.experimental import pallas as pl
from jax.experimental.pallas import tpu as pltpu

_LANE = 128
_SUBLANE = 8


def _round_up(x, m):
    return ((x + m - 1) // m) * m


# ---------------------------------------------------------------------------
# One-time hardware / capability probes (cached; never on the hot path).
# ---------------------------------------------------------------------------
@functools.lru_cache(maxsize=1)
def _vmem_capacity_bytes():
    """Physical VMEM per TensorCore (64 MiB on v7x, 128 MiB on v5e/v6e)."""
    try:
        cap = getattr(pltpu.get_tpu_info(), "vmem_capacity_bytes", None)
        if cap:
            return int(cap)
    except Exception:
        pass
    return 128 << 20  # conservative default: v5e/v6e


@functools.lru_cache(maxsize=1)
def _single_buffer_mode():
    """Return pl.Buffered(buffer_count=1) if supported by this JAX, else None.

    Compile-only probe (no execution), run once per process. Single-buffering
    is only used for constant-index weight/bias blocks, so it is always
    semantically safe; this probe just checks that lowering accepts it.
    """
    try:
        mode = pl.Buffered(buffer_count=1)
    except Exception:
        return None

    def probe_kernel(x_ref, w_ref, o_ref):
        o_ref[...] = x_ref[...] + w_ref[...]

    try:
        call = pl.pallas_call(
            probe_kernel,
            out_shape=jax.ShapeDtypeStruct((2 * _SUBLANE, _LANE), jnp.float32),
            grid_spec=pltpu.PrefetchScalarGridSpec(
                num_scalar_prefetch=0,
                grid=(2,),
                in_specs=[
                    pl.BlockSpec((_SUBLANE, _LANE), lambda i: (i, 0)),
                    pl.BlockSpec((_SUBLANE, _LANE), lambda i: (0, 0),
                                 pipeline_mode=mode),
                ],
                out_specs=pl.BlockSpec((_SUBLANE, _LANE), lambda i: (i, 0)),
            ),
        )
        jax.jit(call).lower(
            jnp.zeros((2 * _SUBLANE, _LANE), jnp.float32),
            jnp.zeros((_SUBLANE, _LANE), jnp.float32),
        ).compile()
        return mode
    except Exception:
        return None


# ---------------------------------------------------------------------------
# Kernel body: whole 5-layer MLP fused; intermediates stay in VMEM / vregs.
# ---------------------------------------------------------------------------
def nn3_kernel(x_ref,
               ws_ref, bs_ref,
               w1_ref, b1_ref,
               w2_ref, b2_ref,
               w3_ref, b3_ref,
               wf_ref, bf_ref,
               o_ref):

    def dense(h, w_ref, b_ref, relu):
        # MXU matmul with f32 accumulation; bias add + ReLU stay in f32 (VPU).
        y = jnp.dot(h.astype(w_ref.dtype), w_ref[...],
                    preferred_element_type=jnp.float32) + b_ref[...]
        return jnp.maximum(y, 0.0) if relu else y

    h = x_ref[...]
    h = dense(h, ws_ref, bs_ref, relu=True)
    h = dense(h, w1_ref, b1_ref, relu=True)
    h = dense(h, w2_ref, b2_ref, relu=True)
    h = dense(h, w3_ref, b3_ref, relu=True)
    y = dense(h, wf_ref, bf_ref, relu=False)
    o_ref[...] = y.astype(o_ref.dtype)


# ---------------------------------------------------------------------------
# Tiling policy.
# ---------------------------------------------------------------------------
def _pick_tile(B, n_width_p, small_vmem):
    if small_vmem:
        # v7x: 64 MiB VMEM, 2 TensorCores -> once B > 128 give megacore >= 2
        # grid steps (about 0.35 us extra pipeline overhead, ~2x the cores fed).
        if B <= 128:
            base = B
        else:
            base = min(256, _round_up(pl.cdiv(B, 2), _SUBLANE))
    else:
        # v5e/v6e: 128 MiB VMEM -> bigger row tiles get closer to HBM roofline.
        base = B if B <= 256 else 512

    # Cap tm so ~5 live (tm, n_width_p) f32 activations stay within a small
    # budget, keeping the layer chain mostly in vregs instead of spilling.
    act_budget = (2 << 20) if small_vmem else (4 << 20)
    cap = act_budget // max(1, n_width_p * 4 * 5)
    cap = max(_SUBLANE, (cap // _SUBLANE) * _SUBLANE)

    tm = min(base, cap)
    if tm < B:
        tm = max(_SUBLANE, (tm // _SUBLANE) * _SUBLANE)   # (8,·) block constraint
    else:
        tm = B                                            # full-dim block is always legal
    return tm


# ---------------------------------------------------------------------------
# Cached pallas_call builder (one compile per static configuration).
# ---------------------------------------------------------------------------
@functools.lru_cache(maxsize=None)
def _build_nn3_call(B_pad, tm, n_dim, n_width_p, n_out_p, w_dtype_name):
    w_dtype = jnp.dtype(w_dtype_name)
    mode = _single_buffer_mode()   # pl.Buffered(1) or None

    # ---- VMEM footprint estimate, per actual buffering mode.
    itemsize = w_dtype.itemsize
    weight_bytes = (n_dim * n_width_p + 3 * n_width_p * n_width_p
                    + n_width_p * n_out_p) * itemsize
    bias_bytes = (4 * n_width_p + n_out_p) * 4
    w_copies = 1 if mode is not None else 2
    tile_bytes = 2 * (tm * n_dim * itemsize + tm * n_out_p * 4)   # dbl-buffered x/out
    act_bytes = 5 * tm * n_width_p * 4                             # live layer chain
    est = w_copies * (weight_bytes + bias_bytes) + tile_bytes + act_bytes

    cap = _vmem_capacity_bytes()
    hard_cap = max(32 << 20, cap - (8 << 20))    # leave internal-scratch headroom
    vmem_limit = None
    if est > (32 << 20):
        vmem_limit = min(_round_up(est, 1 << 20) + (2 << 20), hard_cap)
        # TODO(synk): if est > hard_cap (very wide n_width, especially on v7x),
        # switch to a K/N-tiled accumulator grid instead of weight-resident.

    def const_spec(shape):
        if mode is None:
            return pl.BlockSpec(shape, lambda i: (0, 0))
        return pl.BlockSpec(shape, lambda i: (0, 0), pipeline_mode=mode)

    w_shapes = [(n_dim, n_width_p), (n_width_p, n_width_p), (n_width_p, n_width_p),
                (n_width_p, n_width_p), (n_width_p, n_out_p)]
    b_shapes = [(1, n_width_p)] * 4 + [(1, n_out_p)]

    in_specs = [pl.BlockSpec((tm, n_dim), lambda i: (i, 0))]
    for w_shape, b_shape in zip(w_shapes, b_shapes):
        in_specs.append(const_spec(w_shape))
        in_specs.append(const_spec(b_shape))

    flops = 2 * B_pad * (n_dim * n_width_p + 3 * n_width_p * n_width_p
                         + n_width_p * n_out_p)
    bytes_accessed = (B_pad * n_dim * itemsize + weight_bytes + bias_bytes
                      + B_pad * n_out_p * 4)

    return pl.pallas_call(
        nn3_kernel,
        out_shape=jax.ShapeDtypeStruct((B_pad, n_out_p), jnp.float32),
        grid_spec=pltpu.PrefetchScalarGridSpec(
            num_scalar_prefetch=0,
            grid=(B_pad // tm,),
            in_specs=in_specs,
            out_specs=pl.BlockSpec((tm, n_out_p), lambda i: (i, 0)),
        ),
        compiler_params=pltpu.CompilerParams(
            dimension_semantics=("parallel",),
            vmem_limit_bytes=vmem_limit),
        cost_estimate=pl.CostEstimate(
            flops=flops, transcendentals=0, bytes_accessed=bytes_accessed),
    )


# ---------------------------------------------------------------------------
# One-time parameter preparation: pad hidden/out widths to lane multiples and
# cast weights to the compute dtype (biases stay f32).
# ---------------------------------------------------------------------------
def prepare_nn3_params(params, *, compute_dtype=jnp.float32):
    w_dtype = jnp.dtype(compute_dtype)
    n_dim, n_width = params["ws"].shape
    n_out = params["wf"].shape[1]
    n_width_p = max(_LANE, _round_up(n_width, _LANE))
    n_out_p = max(_LANE, _round_up(n_out, _LANE))

    def pad2(a, rows, cols):
        r, c = a.shape
        if r == rows and c == cols:
            return a
        return jnp.pad(a, ((0, rows - r), (0, cols - c)))

    prepared = {
        "ws": pad2(params["ws"], n_dim, n_width_p).astype(w_dtype),
        "bs": pad2(params["bs"], 1, n_width_p),
        "w1": pad2(params["w1"], n_width_p, n_width_p).astype(w_dtype),
        "b1": pad2(params["b1"], 1, n_width_p),
        "w2": pad2(params["w2"], n_width_p, n_width_p).astype(w_dtype),
        "b2": pad2(params["b2"], 1, n_width_p),
        "w3": pad2(params["w3"], n_width_p, n_width_p).astype(w_dtype),
        "b3": pad2(params["b3"], 1, n_width_p),
        "wf": pad2(params["wf"], n_width_p, n_out_p).astype(w_dtype),
        "bf": pad2(params["bf"], 1, n_out_p),
    }
    return prepared, n_out


# ---------------------------------------------------------------------------
# Forward pass (jit-able; the trailing slice fuses into the jitted graph).
# ---------------------------------------------------------------------------
def nn3_forward(x, prepared, n_out):
    B, n_dim = x.shape
    n_width_p = prepared["ws"].shape[1]
    n_out_p = prepared["wf"].shape[1]
    w_dtype = jnp.dtype(prepared["ws"].dtype)

    small_vmem = _vmem_capacity_bytes() <= (64 << 20)     # v7x-class chip
    tm = _pick_tile(B, n_width_p, small_vmem)
    B_pad = _round_up(B, tm)
    if B_pad != B:
        x = jnp.pad(x, ((0, B_pad - B), (0, 0)))

    call = _build_nn3_call(B_pad, tm, n_dim, n_width_p, n_out_p, w_dtype.name)
    out = call(x.astype(w_dtype),
               prepared["ws"], prepared["bs"],
               prepared["w1"], prepared["b1"],
               prepared["w2"], prepared["b2"],
               prepared["w3"], prepared["b3"],
               prepared["wf"], prepared["bf"])
    return out[:B, :n_out]


nn3_forward_jit = jax.jit(nn3_forward, static_argnums=(2,))


# ---------------------------------------------------------------------------
# Initialization (matches the PyTorch module) and a pure-JAX reference.
# ---------------------------------------------------------------------------
def xavier_normal(key, fan_in, fan_out):
    # matches torch.nn.init.xavier_normal_ (gain=1); stored as (in, out)
    std = jnp.sqrt(2.0 / (fan_in + fan_out))
    return jax.random.normal(key, (fan_in, fan_out), dtype=jnp.float32) * std


def init_nn3_params(key, n_dim, n_width, n_out):
    k_s, k_1, k_2, k_3, k_f = jax.random.split(key, 5)
    return {
        "ws": xavier_normal(k_s, n_dim, n_width),
        "bs": jnp.zeros((1, n_width), jnp.float32),
        "w1": xavier_normal(k_1, n_width, n_width),
        "b1": jnp.zeros((1, n_width), jnp.float32),
        "w2": xavier_normal(k_2, n_width, n_width),
        "b2": jnp.zeros((1, n_width), jnp.float32),
        "w3": xavier_normal(k_3, n_width, n_width),
        "b3": jnp.zeros((1, n_width), jnp.float32),
        "wf": xavier_normal(k_f, n_width, n_out),
        "bf": jnp.zeros((1, n_out), jnp.float32),
    }


def nn3_reference(x, p):
    h = jax.nn.relu(x @ p["ws"] + p["bs"])
    h = jax.nn.relu(h @ p["w1"] + p["b1"])
    h = jax.nn.relu(h @ p["w2"] + p["b2"])
    h = jax.nn.relu(h @ p["w3"] + p["b3"])
    return h @ p["wf"] + p["bf"]


if __name__ == "__main__":
    n_dim, n_width, n_out = 4, 32, 8
    B = 64

    key = jax.random.PRNGKey(0)
    k_x, k_p = jax.random.split(key)
    x = jax.random.normal(k_x, (B, n_dim), dtype=jnp.float32)
    params = init_nn3_params(k_p, n_dim, n_width, n_out)

    # One-time prepare (pad/cast); default f32 compute == PyTorch semantics.
    prepared, n_out_real = prepare_nn3_params(params, compute_dtype=jnp.float32)

    out = nn3_forward_jit(x, prepared, n_out_real)
    out = jax.block_until_ready(out)

    ref = nn3_reference(x, params)
    assert out.shape == (B, n_out)
    assert jnp.allclose(out, ref, atol=1e-4, rtol=1e-4), float(
        jnp.max(jnp.abs(out - ref)))

    print("KERNEL_OK")
</pallas_src>

<mosaic_0001>
module attributes {stable_mosaic.version = 11 : i64} {
  func.func @nn3_kernel(%arg0: i32, %arg1: memref<64x4xf32, #tpu.memory_space<vmem>>, %arg2: memref<4x128xf32, #tpu.memory_space<vmem>>, %arg3: memref<1x128xf32, #tpu.memory_space<vmem>>, %arg4: memref<128x128xf32, #tpu.memory_space<vmem>>, %arg5: memref<1x128xf32, #tpu.memory_space<vmem>>, %arg6: memref<128x128xf32, #tpu.memory_space<vmem>>, %arg7: memref<1x128xf32, #tpu.memory_space<vmem>>, %arg8: memref<128x128xf32, #tpu.memory_space<vmem>>, %arg9: memref<1x128xf32, #tpu.memory_space<vmem>>, %arg10: memref<128x128xf32, #tpu.memory_space<vmem>>, %arg11: memref<1x128xf32, #tpu.memory_space<vmem>>, %arg12: memref<64x128xf32, #tpu.memory_space<vmem>>) attributes {dimension_semantics = [#tpu.dimension_semantics<parallel>], iteration_bounds = array<i64: 1>, scalar_prefetch = 0 : i64, scratch_operands = 0 : i64, tpu.core_type = #tpu.core_type<tc>, window_params = [{transform_indices = @transform_0, window_bounds = array<i64: 64, 4>}, {pipeline_mode = #tpu.pipeline_mode<synchronous>, transform_indices = @transform_1, window_bounds = array<i64: 4, 128>}, {pipeline_mode = #tpu.pipeline_mode<synchronous>, transform_indices = @transform_2, window_bounds = array<i64: 1, 128>}, {pipeline_mode = #tpu.pipeline_mode<synchronous>, transform_indices = @transform_3, window_bounds = array<i64: 128, 128>}, {pipeline_mode = #tpu.pipeline_mode<synchronous>, transform_indices = @transform_4, window_bounds = array<i64: 1, 128>}, {pipeline_mode = #tpu.pipeline_mode<synchronous>, transform_indices = @transform_5, window_bounds = array<i64: 128, 128>}, {pipeline_mode = #tpu.pipeline_mode<synchronous>, transform_indices = @transform_6, window_bounds = array<i64: 1, 128>}, {pipeline_mode = #tpu.pipeline_mode<synchronous>, transform_indices = @transform_7, window_bounds = array<i64: 128, 128>}, {pipeline_mode = #tpu.pipeline_mode<synchronous>, transform_indices = @transform_8, window_bounds = array<i64: 1, 128>}, {pipeline_mode = #tpu.pipeline_mode<synchronous>, transform_indices = @transform_9, window_bounds = array<i64: 128, 128>}, {pipeline_mode = #tpu.pipeline_mode<synchronous>, transform_indices = @transform_10, window_bounds = array<i64: 1, 128>}, {transform_indices = @transform_11, window_bounds = array<i64: 64, 128>}]} {
    %c0 = arith.constant 0 : index
    %c0_0 = arith.constant 0 : index
    %0 = vector.load %arg1[%c0, %c0_0] : memref<64x4xf32, #tpu.memory_space<vmem>>, vector<64x4xf32>
    %c0_1 = arith.constant 0 : index
    %c0_2 = arith.constant 0 : index
    %1 = vector.load %arg2[%c0_1, %c0_2] : memref<4x128xf32, #tpu.memory_space<vmem>>, vector<4x128xf32>
    %cst = arith.constant dense<0.000000e+00> : vector<64x128xf32>
    %2 = tpu.matmul %0, %1, %cst {dimension_numbers = #tpu.dot_dimension_numbers<[1], [0], [0], [1], [0, 0, 1, 1], [], []>} : vector<64x4xf32>, vector<4x128xf32>, vector<64x128xf32> -> vector<64x128xf32>
    %c0_3 = arith.constant 0 : index
    %c0_4 = arith.constant 0 : index
    %3 = vector.load %arg3[%c0_3, %c0_4] : memref<1x128xf32, #tpu.memory_space<vmem>>, vector<1x128xf32>
    %4 = vector.broadcast %3 : vector<1x128xf32> to vector<64x128xf32>
    %5 = arith.addf %2, %4 : vector<64x128xf32>
    %cst_5 = arith.constant 0.000000e+00 : f32
    %6 = vector.broadcast %cst_5 : f32 to vector<64x128xf32>
    %7 = arith.maximumf %5, %6 : vector<64x128xf32>
    %c0_6 = arith.constant 0 : index
    %c0_7 = arith.constant 0 : index
    %8 = vector.load %arg4[%c0_6, %c0_7] : memref<128x128xf32, #tpu.memory_space<vmem>>, vector<128x128xf32>
    %cst_8 = arith.constant dense<0.000000e+00> : vector<64x128xf32>
    %9 = tpu.matmul %7, %8, %cst_8 {dimension_numbers = #tpu.dot_dimension_numbers<[1], [0], [0], [1], [0, 0, 1, 1], [], []>} : vector<64x128xf32>, vector<128x128xf32>, vector<64x128xf32> -> vector<64x128xf32>
    %c0_9 = arith.constant 0 : index
    %c0_10 = arith.constant 0 : index
    %10 = vector.load %arg5[%c0_9, %c0_10] : memref<1x128xf32, #tpu.memory_space<vmem>>, vector<1x128xf32>
    %11 = vector.broadcast %10 : vector<1x128xf32> to vector<64x128xf32>
    %12 = arith.addf %9, %11 : vector<64x128xf32>
    %cst_11 = arith.constant 0.000000e+00 : f32
    %13 = vector.broadcast %cst_11 : f32 to vector<64x128xf32>
    %14 = arith.maximumf %12, %13 : vector<64x128xf32>
    %c0_12 = arith.constant 0 : index
    %c0_13 = arith.constant 0 : index
    %15 = vector.load %arg6[%c0_12, %c0_13] : memref<128x128xf32, #tpu.memory_space<vmem>>, vector<128x128xf32>
    %cst_14 = arith.constant dense<0.000000e+00> : vector<64x128xf32>
    %16 = tpu.matmul %14, %15, %cst_14 {dimension_numbers = #tpu.dot_dimension_numbers<[1], [0], [0], [1], [0, 0, 1, 1], [], []>} : vector<64x128xf32>, vector<128x128xf32>, vector<64x128xf32> -> vector<64x128xf32>
    %c0_15 = arith.constant 0 : index
    %c0_16 = arith.constant 0 : index
    %17 = vector.load %arg7[%c0_15, %c0_16] : memref<1x128xf32, #tpu.memory_space<vmem>>, vector<1x128xf32>
    %18 = vector.broadcast %17 : vector<1x128xf32> to vector<64x128xf32>
    %19 = arith.addf %16, %18 : vector<64x128xf32>
    %cst_17 = arith.constant 0.000000e+00 : f32
    %20 = vector.broadcast %cst_17 : f32 to vector<64x128xf32>
    %21 = arith.maximumf %19, %20 : vector<64x128xf32>
    %c0_18 = arith.constant 0 : index
    %c0_19 = arith.constant 0 : index
    %22 = vector.load %arg8[%c0_18, %c0_19] : memref<128x128xf32, #tpu.memory_space<vmem>>, vector<128x128xf32>
    %cst_20 = arith.constant dense<0.000000e+00> : vector<64x128xf32>
    %23 = tpu.matmul %21, %22, %cst_20 {dimension_numbers = #tpu.dot_dimension_numbers<[1], [0], [0], [1], [0, 0, 1, 1], [], []>} : vector<64x128xf32>, vector<128x128xf32>, vector<64x128xf32> -> vector<64x128xf32>
    %c0_21 = arith.constant 0 : index
    %c0_22 = arith.constant 0 : index
    %24 = vector.load %arg9[%c0_21, %c0_22] : memref<1x128xf32, #tpu.memory_space<vmem>>, vector<1x128xf32>
    %25 = vector.broadcast %24 : vector<1x128xf32> to vector<64x128xf32>
    %26 = arith.addf %23, %25 : vector<64x128xf32>
    %cst_23 = arith.constant 0.000000e+00 : f32
    %27 = vector.broadcast %cst_23 : f32 to vector<64x128xf32>
    %28 = arith.maximumf %26, %27 : vector<64x128xf32>
    %c0_24 = arith.constant 0 : index
    %c0_25 = arith.constant 0 : index
    %29 = vector.load %arg10[%c0_24, %c0_25] : memref<128x128xf32, #tpu.memory_space<vmem>>, vector<128x128xf32>
    %cst_26 = arith.constant dense<0.000000e+00> : vector<64x128xf32>
    %30 = tpu.matmul %28, %29, %cst_26 {dimension_numbers = #tpu.dot_dimension_numbers<[1], [0], [0], [1], [0, 0, 1, 1], [], []>} : vector<64x128xf32>, vector<128x128xf32>, vector<64x128xf32> -> vector<64x128xf32>
    %c0_27 = arith.constant 0 : index
    %c0_28 = arith.constant 0 : index
    %31 = vector.load %arg11[%c0_27, %c0_28] : memref<1x128xf32, #tpu.memory_space<vmem>>, vector<1x128xf32>
    %32 = vector.broadcast %31 : vector<1x128xf32> to vector<64x128xf32>
    %33 = arith.addf %30, %32 : vector<64x128xf32>
    %c0_29 = arith.constant 0 : index
    %c0_30 = arith.constant 0 : index
    %34 = vector.load %arg12[%c0_29, %c0_30] : memref<64x128xf32, #tpu.memory_space<vmem>>, vector<64x128xf32>
    tpu.vector_store %arg12[%c0_29, %c0_30], %33 {strides = array<i32>} : memref<64x128xf32, #tpu.memory_space<vmem>>, vector<64x128xf32>,
    return
  }
  func.func @transform_0(%arg0: i32) -> (i32, i32) {
    %c0_i32 = arith.constant 0 : i32
    %c0_i32_0 = arith.constant 0 : i32
    return %arg0, %c0_i32 : i32, i32
  }
  func.func @transform_1(%arg0: i32) -> (i32, i32) {
    %c0_i32 = arith.constant 0 : i32
    %c0_i32_0 = arith.constant 0 : i32
    %c0_i32_1 = arith.constant 0 : i32
    return %c0_i32, %c0_i32_0 : i32, i32
  }
  func.func @transform_2(%arg0: i32) -> (i32, i32) {
    %c0_i32 = arith.constant 0 : i32
    %c0_i32_0 = arith.constant 0 : i32
    %c0_i32_1 = arith.constant 0 : i32
    return %c0_i32, %c0_i32_0 : i32, i32
  }
  func.func @transform_3(%arg0: i32) -> (i32, i32) {
    %c0_i32 = arith.constant 0 : i32
    %c0_i32_0 = arith.constant 0 : i32
    %c0_i32_1 = arith.constant 0 : i32
    return %c0_i32, %c0_i32_0 : i32, i32
  }
  func.func @transform_4(%arg0: i32) -> (i32, i32) {
    %c0_i32 = arith.constant 0 : i32
    %c0_i32_0 = arith.constant 0 : i32
    %c0_i32_1 = arith.constant 0 : i32
    return %c0_i32, %c0_i32_0 : i32, i32
  }
  func.func @transform_5(%arg0: i32) -> (i32, i32) {
    %c0_i32 = arith.constant 0 : i32
    %c0_i32_0 = arith.constant 0 : i32
    %c0_i32_1 = arith.constant 0 : i32
    return %c0_i32, %c0_i32_0 : i32, i32
  }
  func.func @transform_6(%arg0: i32) -> (i32, i32) {
    %c0_i32 = arith.constant 0 : i32
    %c0_i32_0 = arith.constant 0 : i32
    %c0_i32_1 = arith.constant 0 : i32
    return %c0_i32, %c0_i32_0 : i32, i32
  }
  func.func @transform_7(%arg0: i32) -> (i32, i32) {
    %c0_i32 = arith.constant 0 : i32
    %c0_i32_0 = arith.constant 0 : i32
    %c0_i32_1 = arith.constant 0 : i32
    return %c0_i32, %c0_i32_0 : i32, i32
  }
  func.func @transform_8(%arg0: i32) -> (i32, i32) {
    %c0_i32 = arith.constant 0 : i32
    %c0_i32_0 = arith.constant 0 : i32
    %c0_i32_1 = arith.constant 0 : i32
    return %c0_i32, %c0_i32_0 : i32, i32
  }
  func.func @transform_9(%arg0: i32) -> (i32, i32) {
    %c0_i32 = arith.constant 0 : i32
    %c0_i32_0 = arith.constant 0 : i32
    %c0_i32_1 = arith.constant 0 : i32
    return %c0_i32, %c0_i32_0 : i32, i32
  }
  func.func @transform_10(%arg0: i32) -> (i32, i32) {
    %c0_i32 = arith.constant 0 : i32
    %c0_i32_0 = arith.constant 0 : i32
    %c0_i32_1 = arith.constant 0 : i32
    return %c0_i32, %c0_i32_0 : i32, i32
  }
  func.func @transform_11(%arg0: i32) -> (i32, i32) {
    %c0_i32 = arith.constant 0 : i32
    %c0_i32_0 = arith.constant 0 : i32
    return %arg0, %c0_i32 : i32, i32
  }
}

</mosaic_0001>

<bundles_post_ra>
// kernel: nn3_forward.1
= control target key start
LH: loop header
LB: loop body
LE: loop exit
PB: predicated region body
PF: predicated region fallthrough
CT: control target
= control target key end

     0   :  { %16 = vsyncpa [#allocation3], 0  ;;  %s750_s0 = inlined_call_operand.vmem [shape: f32[64,4], index: 0, kind: input, shape index: {}]   ;;  %s751_s1 = inlined_call_operand.vmem [shape: f32[4,128], index: 1, kind: input, shape index: {}]   ;;  %s752_s2 = inlined_call_operand.vmem [shape: f32[1,128], index: 2, kind: input, shape index: {}]   ;;  %s753_s3 = inlined_call_operand.hbm [shape: f32[128,128], index: 3, kind: input, shape index: {}]   ;;  %s754_s4 = inlined_call_operand.vmem [shape: f32[1,128], index: 4, kind: input, shape index: {}]   ;;  %s755_s5 = inlined_call_operand.hbm [shape: f32[128,128], index: 5, kind: input, shape index: {}]   ;;  %s756_s6 = inlined_call_operand.vmem [shape: f32[1,128], index: 6, kind: input, shape index: {}]   ;;  %s757_s7 = inlined_call_operand.hbm [shape: f32[128,128], index: 7, kind: input, shape index: {}]   ;;  %s758_s8 = inlined_call_operand.vmem [shape: f32[1,128], index: 8, kind: input, shape index: {}]   ;;  %s759_s9 = inlined_call_operand.hbm [shape: f32[128,128], index: 9, kind: input, shape index: {}]   ;;  %s760_s10 = inlined_call_operand.vmem [shape: f32[1,128], index: 10, kind: input, shape index: {}]   ;;  %s761_s11 = inlined_call_operand.vmem [shape: f32[64,128], index: 11, kind: output, shape index: {}]  }
   0x1   :  { %17 = vsyncpa [#allocation5], 0 }
   0x2   :  { %18 = vsyncpa [#allocation8], 0  ;;  %s44_s19 = sshll.u32 %s755_s5, 4  ;;  %s598_s20 = smov [#allocation4]   ;;  %s45_s19 = int_to_ptr.hbm [resolvable:$true] %s44_s19 }
   0x3   :  { %s46_s21 = sshll.u32 %s598_s20, 4  ;;  %s29_s24 = sshll.u32 %s753_s3, 4  ;;  %s47_s21 = int_to_ptr.vmem [resolvable:$true] %s46_s21  ;;  %s30_s24 = int_to_ptr.hbm [resolvable:$true] %s29_s24 }
   0x4   :  { %s599_s25 = smov 128   ;;  %s600_s26 = smov 8  }
   0x5   :  { %52 = dma.hbm_to_vmem [thread:$0]  %s45_s19, 2048, %s47_s21, [#allocation5], %s599_s25, %s599_s25, %s600_s26  }
   0x6   :  { %s601_s27 = smov [#allocation2]   ;;  %s59_s12 = sshll.u32 %s757_s7, 4  ;;  %s60_s12 = int_to_ptr.hbm [resolvable:$true] %s59_s12 }
   0x7   :  { %s31_s28 = sshll.u32 %s601_s27, 4  ;;  %s74_s14 = sshll.u32 %s759_s9, 4  ;;  %s32_s28 = int_to_ptr.vmem [resolvable:$true] %s31_s28  ;;  %s75_s14 = int_to_ptr.hbm [resolvable:$true] %s74_s14 }
   0x8   :  { %37 = dma.hbm_to_vmem [thread:$0]  %s30_s24, 2048, %s32_s28, [#allocation3], %s599_s25, %s599_s25, %s600_s26  }
   0x9   :  { %s602_s15 = smov [#allocation6]   ;;  %s603_s3 = smov [#allocation7]  }
   0xa   :  { %s61_s16 = sshll.u32 %s602_s15, 4  ;;  %s76_s17 = sshll.u32 %s603_s3, 4  ;;  %s62_s16 = int_to_ptr.vmem [resolvable:$true] %s61_s16  ;;  %s77_s17 = int_to_ptr.vmem [resolvable:$true] %s76_s17 }
   0xb   :  { %67 = dma.hbm_to_vmem [thread:$0]  %s60_s12, 2048, %s62_s16, [#allocation5], %s599_s25, %s599_s25, %s600_s26  }
   0xc   :  { %82 = dma.hbm_to_vmem [thread:$0]  %s75_s14, 2048, %s77_s17, [#allocation8], %s599_s25, %s599_s25, %s600_s26  }
   0xd   :  { %592 = dma.done.wait [#allocation3], 2048  }
   0xe   :  { %593 = vsyncadd [#allocation3], 4294965248 }
   0xf   :  { %594 = dma.done.wait [#allocation5], 4096  }
  0x10   :  { %595 = vsyncadd [#allocation5], 4294963200 }
  0x11   :  { %596 = dma.done.wait [#allocation8], 2048  }
  0x12   :  { %597 = vsyncadd [#allocation8], 4294965248  ;;  %vm139_vm0 = vcmask 1043456   ;;  %vm114_vm1 = vcmask 31744   ;;  %v109_v0 = vld [vmem:[%s751_s1] sm:$0xf] }
  0x13   :  { %v101_v1 = vld [vmem:[%s750_s0] sm:$0xff]  ;;  %475 = vmatpush.msk.msra.mxu0 %vm139_vm0, %v109_v0  ;;  %484 = vmatpush.msk.msra.mxu1 %vm139_vm0, %v109_v0  ;;  %v207_v3 = vld [vmem:[#allocation2 + $0x78] sm:$0xff]  ;;  %v206_v4 = vld [vmem:[#allocation2 + $0x70] sm:$0xff] }
  0x14   :  { %v105_v2 = vld [vmem:[%s750_s0 + $0x20] sm:$0xff]  ;;  %476 = vmatmul.msk.f32.vlgmr.msra.gmra.mxu0 %vm114_vm1, %v101_v1  ;;  %v205_v5 = vld [vmem:[#allocation2 + $0x68] sm:$0xff]  ;;  %v203_v9 = vld [vmem:[#allocation2 + $0x58] sm:$0xff] }
  0x15   :  { %480 = vmatmul.msk.f32.vlgmr.msra.gmra.mxu1 %vm114_vm1, %v105_v2  ;;  %v102_v6 = vld [vmem:[%s750_s0 + $0x8] sm:$0xff]  ;;  %v204_v8 = vld [vmem:[#allocation2 + $0x60] sm:$0xff]  ;;  %v202_v10 = vld [vmem:[#allocation2 + $0x50] sm:$0xff] }
  0x16   :  { %212 = vmatpush.msrb.mxu1 %v207_v3  ;;  %v106_v7 = vld [vmem:[%s750_s0 + $0x28] sm:$0xff]  ;;  %v103_v12 = vld [vmem:[%s750_s0 + $0x10] sm:$0xff]  ;;  %v200_v14 = vld [vmem:[#allocation2 + $0x40] sm:$0xff] }
  0x17   :  { %v201_v11 = vld [vmem:[#allocation2 + $0x48] sm:$0xff]  ;;  %v107_v13 = vld [vmem:[%s750_s0 + $0x30] sm:$0xff]  ;;  %v199_v15 = vld [vmem:[#allocation2 + $0x38] sm:$0xff] }
  0x18   :  { %213 = vmatpush.msrb.mxu1 %v206_v4  ;;  %v198_v16 = vld [vmem:[#allocation2 + $0x30] sm:$0xff]  ;;  %v197_v17 = vld [vmem:[#allocation2 + $0x28] sm:$0xff]  ;;  %v104_v18 = vld [vmem:[%s750_s0 + $0x18] sm:$0xff] }
  0x19   :  { %v108_v19 = vld [vmem:[%s750_s0 + $0x38] sm:$0xff]  ;;  %v196_v20 = vld [vmem:[#allocation2 + $0x20] sm:$0xff]  ;;  %v194_v22 = vld [vmem:[#allocation2 + $0x10] sm:$0xff] }
  0x1a   :  { %214 = vmatpush.msrb.mxu1 %v205_v5  ;;  %v195_v21 = vld [vmem:[#allocation2 + $0x18] sm:$0xff]  ;;  %v193_v23 = vld [vmem:[#allocation2 + $0x8] sm:$0xff]  ;;  %v192_v24 = vld [vmem:[#allocation2] sm:$0xff] }
  0x1b   :  { %v491_v25 = vld [vmem:[%s752_s2] ss:$0 sm:$0xff]  ;;  %v276_v40 = vld [vmem:[#allocation4 + $0x78] sm:$0xff]  ;;  %v275_v41 = vld [vmem:[#allocation4 + $0x70] sm:$0xff] }
  0x1c   :  { %477 = vmatmul.msk.f32.gmra.mxu0 %vm114_vm1, %v102_v6  ;;  %215 = vmatpush.msrb.mxu1 %v204_v8  ;;  %v274_v43 = vld [vmem:[#allocation4 + $0x68] sm:$0xff]  ;;  %v273_v45 = vld [vmem:[#allocation4 + $0x60] sm:$0xff]  ;;  %v272_v46 = vld [vmem:[#allocation4 + $0x58] sm:$0xff] }
  0x1d   :  { %481 = vmatmul.msk.f32.gmra.mxu1 %vm114_vm1, %v106_v7  ;;  %281 = vmatpush.msra.mxu2 %v276_v40  ;;  %v271_v48 = vld [vmem:[#allocation4 + $0x50] sm:$0xff]  ;;  %v270_v49 = vld [vmem:[#allocation4 + $0x48] sm:$0xff]  ;;  %v269_v52 = vld [vmem:[#allocation4 + $0x40] sm:$0xff] }
  0x1e   :  { %216 = vmatpush.msrb.mxu1 %v203_v9  ;;  %v268_v53 = vld [vmem:[#allocation4 + $0x38] sm:$0xff]  ;;  %v267_v55 = vld [vmem:[#allocation4 + $0x30] sm:$0xff]  ;;  %v266_v56 = vld [vmem:[#allocation4 + $0x28] sm:$0xff] }
  0x1f   :  { %282 = vmatpush.msra.mxu2 %v275_v41  ;;  %v265_v58 = vld [vmem:[#allocation4 + $0x20] sm:$0xff]  ;;  %v264_v60 = vld [vmem:[#allocation4 + $0x18] sm:$0xff]  ;;  %v263_v63 = vld [vmem:[#allocation4 + $0x10] sm:$0xff] }
  0x20   :  { %217 = vmatpush.msrb.mxu1 %v202_v10  ;;  %v262_v0 = vld [vmem:[#allocation4 + $0x8] sm:$0xff]  ;;  %v261_v1 = vld [vmem:[#allocation4] sm:$0xff]  ;;  %v332_v40 = vld [vmem:[#allocation6 + $0x10] sm:$0xff] }
  0x21   :  { %283 = vmatpush.msra.mxu2 %v274_v43  ;;  %v492_v2 = vld [vmem:[%s754_s4] ss:$0 sm:$0xff]  ;;  %v331_v41 = vld [vmem:[#allocation6 + $0x8] sm:$0xff] }
  0x22   :  { %218 = vmatpush.msrb.mxu1 %v201_v11  ;;  %v493_v43 = vld [vmem:[%s756_s6] ss:$0 sm:$0xff] }
  0x23   :  { %284 = vmatpush.msra.mxu2 %v273_v45 }
  0x24   :  { %478 = vmatmul.msk.f32.gmra.mxu0 %vm114_vm1, %v103_v12  ;;  %219 = vmatpush.msrb.mxu1 %v200_v14 }
  0x25   :  { %482 = vmatmul.msk.f32.gmra.mxu1 %vm114_vm1, %v107_v13  ;;  %285 = vmatpush.msra.mxu2 %v272_v46 }
  0x26   :  { %220 = vmatpush.msrb.mxu1 %v199_v15  ;;  %v345_v15 = vld [vmem:[#allocation6 + $0x78] sm:$0xff] }
  0x27   :  { %286 = vmatpush.msra.mxu2 %v271_v48  ;;  %350 = vmatpush.msra.mxu3 %v345_v15 }
  0x28   :  { %221 = vmatpush.msrb.mxu1 %v198_v16  ;;  %v344_v16 = vld [vmem:[#allocation6 + $0x70] sm:$0xff] }
  0x29   :  { %287 = vmatpush.msra.mxu2 %v270_v49  ;;  %351 = vmatpush.msra.mxu3 %v344_v16 }
  0x2a   :  { %222 = vmatpush.msrb.mxu1 %v197_v17  ;;  %v343_v17 = vld [vmem:[#allocation6 + $0x68] sm:$0xff] }
  0x2b   :  { %288 = vmatpush.msra.mxu2 %v269_v52  ;;  %352 = vmatpush.msra.mxu3 %v343_v17 }
  0x2c   :  { %479 = vmatmul.msk.f32.gmra.mxu0 %vm114_vm1, %v104_v18  ;;  %223 = vmatpush.msrb.mxu1 %v196_v20  ;;  %v342_v20 = vld [vmem:[#allocation6 + $0x60] sm:$0xff] }
  0x2d   :  { %483 = vmatmul.msk.f32.gmra.mxu1 %vm114_vm1, %v108_v19  ;;  %289 = vmatpush.msra.mxu2 %v268_v53 }
  0x2e   :  { %224 = vmatpush.msrb.mxu1 %v195_v21  ;;  %353 = vmatpush.msra.mxu3 %v342_v20  ;;  %v494_v20 = vld [vmem:[%s758_s8] ss:$0 sm:$0xff] }
  0x2f   :  { %290 = vmatpush.msra.mxu2 %v267_v55 }
  0x30   :  { %225 = vmatpush.msrb.mxu1 %v194_v22  ;;  %v341_v22 = vld [vmem:[#allocation6 + $0x58] sm:$0xff] }
  0x31   :  { %291 = vmatpush.msra.mxu2 %v266_v56  ;;  %354 = vmatpush.msra.mxu3 %v341_v22  ;;  %v414_v56 = vld [vmem:[#allocation7 + $0x78] sm:$0xff] }
  0x32   :  { %226 = vmatpush.msrb.mxu1 %v193_v23  ;;  %v340_v23 = vld [vmem:[#allocation6 + $0x50] sm:$0xff]  ;;  %419 = vmatpush.msrb.mxu0 %v414_v56 }
  0x33   :  { %292 = vmatpush.msra.mxu2 %v265_v58  ;;  %355 = vmatpush.msra.mxu3 %v340_v23  ;;  %v412_v58 = vld [vmem:[#allocation7 + $0x68] sm:$0xff] }
  0x34   :  { %227 = vmatpush.msrb.mxu1 %v192_v24  ;;  %v339_v24 = vld [vmem:[#allocation6 + $0x48] sm:$0xff] }
  0x35   :  { %293 = vmatpush.msra.mxu2 %v264_v60  ;;  %356 = vmatpush.msra.mxu3 %v339_v24 }
  0x37   :  { %294 = vmatpush.msra.mxu2 %v263_v63  ;;  %v410_v63 = vld [vmem:[#allocation7 + $0x58] sm:$0xff] }
  0x39   :  { %295 = vmatpush.msra.mxu2 %v262_v0  ;;  %v409_v0 = vld [vmem:[#allocation7 + $0x50] sm:$0xff] }
  0x3b   :  { %296 = vmatpush.msra.mxu2 %v261_v1  ;;  %v408_v1 = vld [vmem:[#allocation7 + $0x48] sm:$0xff] }
  0x91   :  { %v160_v26 = vpop.f32.mrf.mxu0 }
  0x92   :  { %v161_v27 = vadd.f32 %v491_v25, %v160_v26  ;;  %v172_v35 = vpop.f32.mrf.mxu1 }
  0x93   :  { %v173_v39 = vadd.f32 %v491_v25, %v172_v35 }
  0x94   :  { %v184_v28 = vmax.f32 %v161_v27, 0.0  ;;  %v338_v27 = vld [vmem:[#allocation6 + $0x40] sm:$0xff] }
  0x95   :  { %v188_v44 = vmax.f32 %v173_v39, 0.0  ;;  %357 = vmatpush.msra.mxu3 %v338_v27 }
  0x96   :  { %228 = vmatmul.f32.vlgmr.msrb.gmra.mxu1 %v184_v28 }
  0x99   :  { %v163_v29 = vpop.f32.mrf.mxu0 }
  0x9a   :  { %v164_v30 = vadd.f32 %v491_v25, %v163_v29  ;;  %v175_v42 = vpop.f32.mrf.mxu1  ;;  %v337_v29 = vld [vmem:[#allocation6 + $0x38] sm:$0xff] }
  0x9b   :  { %v176_v47 = vadd.f32 %v491_v25, %v175_v42  ;;  %358 = vmatpush.msra.mxu3 %v337_v29  ;;  %v330_v42 = vld [vmem:[#allocation6] sm:$0xff] }
  0x9c   :  { %v185_v31 = vmax.f32 %v164_v30, 0.0  ;;  %v336_v30 = vld [vmem:[#allocation6 + $0x30] sm:$0xff] }
  0x9d   :  { %v189_v51 = vmax.f32 %v176_v47, 0.0  ;;  %359 = vmatpush.msra.mxu3 %v336_v30 }
  0x9e   :  { %231 = vmatmul.f32.gmra.mxu1 %v185_v31  ;;  %v335_v31 = vld [vmem:[#allocation6 + $0x28] sm:$0xff] }
  0x9f   :  { %360 = vmatpush.msra.mxu3 %v335_v31 }
  0xa1   :  { %v166_v32 = vpop.f32.mrf.mxu0 }
  0xa2   :  { %v167_v33 = vadd.f32 %v491_v25, %v166_v32  ;;  %v178_v50 = vpop.f32.mrf.mxu1 }
  0xa3   :  { %v179_v54 = vadd.f32 %v491_v25, %v178_v50 }
  0xa4   :  { %v186_v34 = vmax.f32 %v167_v33, 0.0 }
  0xa5   :  { %v190_v57 = vmax.f32 %v179_v54, 0.0 }
  0xa6   :  { %234 = vmatmul.f32.gmra.mxu1 %v186_v34  ;;  %v334_v34 = vld [vmem:[#allocation6 + $0x20] sm:$0xff] }
  0xa7   :  { %361 = vmatpush.msra.mxu3 %v334_v34 }
  0xa9   :  { %v169_v36 = vpop.f32.mrf.mxu0 }
  0xaa   :  { %v170_v37 = vadd.f32 %v491_v25, %v169_v36  ;;  %v181_v59 = vpop.f32.mrf.mxu1  ;;  %v333_v36 = vld [vmem:[#allocation6 + $0x18] sm:$0xff] }
  0xab   :  { %v182_v61 = vadd.f32 %v491_v25, %v181_v59  ;;  %362 = vmatpush.msra.mxu3 %v333_v36 }
  0xac   :  { %v187_v38 = vmax.f32 %v170_v37, 0.0 }
  0xad   :  { %v191_v62 = vmax.f32 %v182_v61, 0.0  ;;  %363 = vmatpush.msra.mxu3 %v332_v40  ;;  %v411_v61 = vld [vmem:[#allocation7 + $0x60] sm:$0xff] }
  0xae   :  { %237 = vmatmul.f32.gmra.mxu1 %v187_v38 }
  0xaf   :  { %364 = vmatpush.msra.mxu3 %v331_v41 }
  0xb1   :  { %365 = vmatpush.msra.mxu3 %v330_v42 }
  0xb6   :  { %240 = vmatmul.f32.gmra.mxu1 %v188_v44 }
  0xbe   :  { %243 = vmatmul.f32.gmra.mxu1 %v189_v51 }
  0xc6   :  { %246 = vmatmul.f32.gmra.mxu1 %v190_v57  ;;  %v413_v57 = vld [vmem:[#allocation7 + $0x70] sm:$0xff] }
  0xc7   :  { %420 = vmatpush.msrb.mxu0 %v413_v57 }
  0xc9   :  { %421 = vmatpush.msrb.mxu0 %v412_v58 }
  0xcb   :  { %422 = vmatpush.msrb.mxu0 %v411_v61 }
  0xcd   :  { %423 = vmatpush.msrb.mxu0 %v410_v63 }
  0xce   :  { %249 = vmatmul.f32.gmra.mxu1 %v191_v62 }
  0xcf   :  { %424 = vmatpush.msrb.mxu0 %v409_v0 }
  0xd1   :  { %425 = vmatpush.msrb.mxu0 %v408_v1 }
 0x113   :  { %v229_v3 = vpop.f32.mrf.mxu1 }
 0x114   :  { %v230_v4 = vadd.f32 %v492_v2, %v229_v3 }
 0x116   :  { %v253_v5 = vmax.f32 %v230_v4, 0.0  ;;  %v407_v4 = vld [vmem:[#allocation7 + $0x40] sm:$0xff] }
 0x117   :  { %426 = vmatpush.msrb.mxu0 %v407_v4 }
 0x118   :  { %297 = vmatmul.f32.vlgmr.msra.gmra.mxu2 %v253_v5 }
 0x11b   :  { %v232_v6 = vpop.f32.mrf.mxu1 }
 0x11c   :  { %v233_v7 = vadd.f32 %v492_v2, %v232_v6  ;;  %v406_v6 = vld [vmem:[#allocation7 + $0x38] sm:$0xff] }
 0x11d   :  { %427 = vmatpush.msrb.mxu0 %v406_v6 }
 0x11e   :  { %v254_v8 = vmax.f32 %v233_v7, 0.0  ;;  %v405_v7 = vld [vmem:[#allocation7 + $0x30] sm:$0xff] }
 0x11f   :  { %428 = vmatpush.msrb.mxu0 %v405_v7 }
 0x120   :  { %300 = vmatmul.f32.gmra.mxu2 %v254_v8  ;;  %v404_v8 = vld [vmem:[#allocation7 + $0x28] sm:$0xff] }
 0x121   :  { %429 = vmatpush.msrb.mxu0 %v404_v8 }
 0x123   :  { %v235_v9 = vpop.f32.mrf.mxu1 }
 0x124   :  { %v236_v10 = vadd.f32 %v492_v2, %v235_v9 }
 0x126   :  { %v255_v11 = vmax.f32 %v236_v10, 0.0 }
 0x128   :  { %303 = vmatmul.f32.gmra.mxu2 %v255_v11  ;;  %v403_v11 = vld [vmem:[#allocation7 + $0x20] sm:$0xff] }
 0x129   :  { %430 = vmatpush.msrb.mxu0 %v403_v11 }
 0x12b   :  { %v238_v12 = vpop.f32.mrf.mxu1 }
 0x12c   :  { %v239_v13 = vadd.f32 %v492_v2, %v238_v12 }
 0x12e   :  { %v256_v14 = vmax.f32 %v239_v13, 0.0  ;;  %v402_v13 = vld [vmem:[#allocation7 + $0x18] sm:$0xff] }
 0x12f   :  { %431 = vmatpush.msrb.mxu0 %v402_v13 }
 0x130   :  { %306 = vmatmul.f32.gmra.mxu2 %v256_v14  ;;  %v401_v14 = vld [vmem:[#allocation7 + $0x10] sm:$0xff] }
 0x131   :  { %432 = vmatpush.msrb.mxu0 %v401_v14 }
 0x133   :  { %v241_v18 = vpop.f32.mrf.mxu1 }
 0x134   :  { %v242_v19 = vadd.f32 %v492_v2, %v241_v18  ;;  %v400_v18 = vld [vmem:[#allocation7 + $0x8] sm:$0xff] }
 0x135   :  { %433 = vmatpush.msrb.mxu0 %v400_v18 }
 0x136   :  { %v257_v21 = vmax.f32 %v242_v19, 0.0  ;;  %v399_v19 = vld [vmem:[#allocation7] sm:$0xff] }
 0x137   :  { %434 = vmatpush.msrb.mxu0 %v399_v19 }
 0x138   :  { %309 = vmatmul.f32.gmra.mxu2 %v257_v21 }
 0x13b   :  { %v244_v25 = vpop.f32.mrf.mxu1 }
 0x13c   :  { %v245_v26 = vadd.f32 %v492_v2, %v244_v25 }
 0x13e   :  { %v258_v28 = vmax.f32 %v245_v26, 0.0 }
 0x140   :  { %312 = vmatmul.f32.gmra.mxu2 %v258_v28 }
 0x143   :  { %v247_v32 = vpop.f32.mrf.mxu1 }
 0x144   :  { %v248_v33 = vadd.f32 %v492_v2, %v247_v32 }
 0x146   :  { %v259_v35 = vmax.f32 %v248_v33, 0.0 }
 0x148   :  { %315 = vmatmul.f32.gmra.mxu2 %v259_v35 }
 0x14b   :  { %v250_v37 = vpop.f32.mrf.mxu1 }
 0x14c   :  { %v251_v38 = vadd.f32 %v492_v2, %v250_v37 }
 0x14e   :  { %v260_v39 = vmax.f32 %v251_v38, 0.0 }
 0x150   :  { %318 = vmatmul.f32.gmra.mxu2 %v260_v39 }
 0x19b   :  { %v298_v44 = vpop.f32.mrf.mxu2 }
 0x19c   :  { %v299_v45 = vadd.f32 %v493_v43, %v298_v44 }
 0x19e   :  { %v322_v46 = vmax.f32 %v299_v45, 0.0  ;;  %v495_v45 = vld [vmem:[%s760_s10] ss:$0 sm:$0xff] }
 0x1a0   :  { %366 = vmatmul.f32.vlgmr.msra.gmra.mxu3 %v322_v46 }
 0x1a3   :  { %v301_v47 = vpop.f32.mrf.mxu2 }
 0x1a4   :  { %v302_v48 = vadd.f32 %v493_v43, %v301_v47 }
 0x1a6   :  { %v323_v49 = vmax.f32 %v302_v48, 0.0 }
 0x1a8   :  { %369 = vmatmul.f32.gmra.mxu3 %v323_v49 }
 0x1ab   :  { %v304_v50 = vpop.f32.mrf.mxu2 }
 0x1ac   :  { %v305_v51 = vadd.f32 %v493_v43, %v304_v50 }
 0x1ae   :  { %v324_v52 = vmax.f32 %v305_v51, 0.0 }
 0x1b0   :  { %372 = vmatmul.f32.gmra.mxu3 %v324_v52 }
 0x1b3   :  { %v307_v53 = vpop.f32.mrf.mxu2 }
 0x1b4   :  { %v308_v54 = vadd.f32 %v493_v43, %v307_v53 }
 0x1b6   :  { %v325_v55 = vmax.f32 %v308_v54, 0.0 }
 0x1b8   :  { %375 = vmatmul.f32.gmra.mxu3 %v325_v55 }
 0x1bb   :  { %v310_v59 = vpop.f32.mrf.mxu2 }
 0x1bc   :  { %v311_v60 = vadd.f32 %v493_v43, %v310_v59 }
 0x1be   :  { %v326_v62 = vmax.f32 %v311_v60, 0.0 }
 0x1c0   :  { %378 = vmatmul.f32.gmra.mxu3 %v326_v62 }
 0x1c3   :  { %v313_v2 = vpop.f32.mrf.mxu2 }
 0x1c4   :  { %v314_v3 = vadd.f32 %v493_v43, %v313_v2 }
 0x1c6   :  { %v327_v5 = vmax.f32 %v314_v3, 0.0 }
 0x1c8   :  { %381 = vmatmul.f32.gmra.mxu3 %v327_v5 }
 0x1cb   :  { %v316_v9 = vpop.f32.mrf.mxu2 }
 0x1cc   :  { %v317_v10 = vadd.f32 %v493_v43, %v316_v9 }
 0x1ce   :  { %v328_v12 = vmax.f32 %v317_v10, 0.0 }
 0x1d0   :  { %384 = vmatmul.f32.gmra.mxu3 %v328_v12 }
 0x1d3   :  { %v319_v15 = vpop.f32.mrf.mxu2 }
 0x1d4   :  { %v320_v16 = vadd.f32 %v493_v43, %v319_v15 }
 0x1d6   :  { %v329_v17 = vmax.f32 %v320_v16, 0.0 }
 0x1d8   :  { %387 = vmatmul.f32.gmra.mxu3 %v329_v17 }
 0x223   :  { %v367_v21 = vpop.f32.mrf.mxu3 }
 0x224   :  { %v368_v22 = vadd.f32 %v494_v20, %v367_v21 }
 0x226   :  { %v391_v23 = vmax.f32 %v368_v22, 0.0 }
 0x228   :  { %435 = vmatmul.f32.vlgmr.msrb.gmra.mxu0 %v391_v23 }
 0x22b   :  { %v370_v24 = vpop.f32.mrf.mxu3 }
 0x22c   :  { %v371_v25 = vadd.f32 %v494_v20, %v370_v24 }
 0x22e   :  { %v392_v26 = vmax.f32 %v371_v25, 0.0 }
 0x230   :  { %438 = vmatmul.f32.gmra.mxu0 %v392_v26 }
 0x233   :  { %v373_v27 = vpop.f32.mrf.mxu3 }
 0x234   :  { %v374_v28 = vadd.f32 %v494_v20, %v373_v27 }
 0x236   :  { %v393_v29 = vmax.f32 %v374_v28, 0.0 }
 0x238   :  { %441 = vmatmul.f32.gmra.mxu0 %v393_v29 }
 0x23b   :  { %v376_v30 = vpop.f32.mrf.mxu3 }
 0x23c   :  { %v377_v31 = vadd.f32 %v494_v20, %v376_v30 }
 0x23e   :  { %v394_v32 = vmax.f32 %v377_v31, 0.0 }
 0x240   :  { %444 = vmatmul.f32.gmra.mxu0 %v394_v32 }
 0x243   :  { %v379_v33 = vpop.f32.mrf.mxu3 }
 0x244   :  { %v380_v34 = vadd.f32 %v494_v20, %v379_v33 }
 0x246   :  { %v395_v35 = vmax.f32 %v380_v34, 0.0 }
 0x248   :  { %447 = vmatmul.f32.gmra.mxu0 %v395_v35 }
 0x24b   :  { %v382_v36 = vpop.f32.mrf.mxu3 }
 0x24c   :  { %v383_v37 = vadd.f32 %v494_v20, %v382_v36 }
 0x24e   :  { %v396_v38 = vmax.f32 %v383_v37, 0.0 }
 0x250   :  { %450 = vmatmul.f32.gmra.mxu0 %v396_v38 }
 0x253   :  { %v385_v39 = vpop.f32.mrf.mxu3 }
 0x254   :  { %v386_v40 = vadd.f32 %v494_v20, %v385_v39 }
 0x256   :  { %v397_v41 = vmax.f32 %v386_v40, 0.0 }
 0x258   :  { %453 = vmatmul.f32.gmra.mxu0 %v397_v41 }
 0x25b   :  { %v388_v42 = vpop.f32.mrf.mxu3 }
 0x25c   :  { %v389_v43 = vadd.f32 %v494_v20, %v388_v42 }
 0x25e   :  { %v398_v44 = vmax.f32 %v389_v43, 0.0 }
 0x260   :  { %456 = vmatmul.f32.gmra.mxu0 %v398_v44 }
 0x2a5   :  { %v436_v46 = vpop.f32.mrf.mxu0 }
 0x2a6   :  { %v437_v47 = vadd.f32 %v495_v45, %v436_v46 }
 0x2a8   :  { %460 = vst [vmem:[%s761_s11] sm:$0xff] %v437_v47 }
 0x2ad   :  { %v439_v48 = vpop.f32.mrf.mxu0 }
 0x2ae   :  { %v440_v49 = vadd.f32 %v495_v45, %v439_v48 }
 0x2b0   :  { %461 = vst [vmem:[%s761_s11 + $0x8] sm:$0xff] %v440_v49 }
 0x2b5   :  { %v442_v50 = vpop.f32.mrf.mxu0 }
 0x2b6   :  { %v443_v51 = vadd.f32 %v495_v45, %v442_v50 }
 0x2b8   :  { %462 = vst [vmem:[%s761_s11 + $0x10] sm:$0xff] %v443_v51 }
 0x2bd   :  { %v445_v52 = vpop.f32.mrf.mxu0 }
 0x2be   :  { %v446_v53 = vadd.f32 %v495_v45, %v445_v52 }
 0x2c0   :  { %463 = vst [vmem:[%s761_s11 + $0x18] sm:$0xff] %v446_v53 }
 0x2c5   :  { %v448_v54 = vpop.f32.mrf.mxu0 }
 0x2c6   :  { %v449_v55 = vadd.f32 %v495_v45, %v448_v54 }
 0x2c8   :  { %464 = vst [vmem:[%s761_s11 + $0x20] sm:$0xff] %v449_v55 }
 0x2cd   :  { %v451_v56 = vpop.f32.mrf.mxu0 }
 0x2ce   :  { %v452_v57 = vadd.f32 %v495_v45, %v451_v56 }
 0x2d0   :  { %465 = vst [vmem:[%s761_s11 + $0x28] sm:$0xff] %v452_v57 }
 0x2d5   :  { %v454_v58 = vpop.f32.mrf.mxu0 }
 0x2d6   :  { %v455_v59 = vadd.f32 %v495_v45, %v454_v58 }
 0x2d8   :  { %466 = vst [vmem:[%s761_s11 + $0x30] sm:$0xff] %v455_v59 }
 0x2dd   :  { %v457_v60 = vpop.f32.mrf.mxu0 }
 0x2de   :  { %v458_v61 = vadd.f32 %v495_v45, %v457_v60 }
 0x2e0   :  { %467 = vst [vmem:[%s761_s11 + $0x38] sm:$0xff] %v458_v61 }
 0x2e1   :  { %472 = vsyncpa [#allocation3], 1 }
 0x2e2   :  { %473 = vsyncpa [#allocation5], 1 }
 0x2e3   :  { %474 = vsyncpa [#allocation8], 1 }

</bundles_post_ra>
